<compile_context>
chip_gen: v5e
topology: v5e:2x2
jax: 0.10.0
libtpu: 0.0.40
codegen_flags: <defaults>
</compile_context>

<pallas_src>
import functools

import jax
import jax.numpy as jnp
from jax.experimental import pallas as pl
from jax.experimental.pallas import tpu as pltpu


# ----------------------------------------------------------------------------
# helpers
# ----------------------------------------------------------------------------

def _round_up(x: int, m: int) -> int:
    return ((x + m - 1) // m) * m


def _pick_tn(dim: int, max_tn: int = 768) -> int:
    """Output-column tile: prefer 256-multiples dividing 3*dim (2x256^2 MXU)."""
    out_dim = 3 * dim
    cands = [c for c in range(max_tn, 127, -128) if c <= out_dim]
    for c in cands:
        if c % 256 == 0 and out_dim % c == 0:
            return c
    for c in cands:                      # any 128-multiple divisor
        if out_dim % c == 0:
            return c
    return out_dim                       # odd/tiny dims: one full-width tile


def _tiles(M: int, dim: int, tm: int, tn, cdtype):
    """Pick (tm_eff, tn_eff, M_pad) for the given token count / compute dtype."""
    sub = 32 // jnp.dtype(cdtype).itemsize        # sublane packing (8 f32, 16 bf16)
    tm_eff = _round_up(max(sub, min(int(tm), _round_up(M, sub))), sub)
    M_pad = _round_up(M, tm_eff)
    # Keep >= 2 token tiles so the "parallel" i axis can shard across both
    # TensorCores (v7x megacore) even when M is small.
    if M_pad // tm_eff < 2 and M > sub:
        tm_eff = _round_up(-(-M // 2), sub)
        M_pad = _round_up(M, tm_eff)
    tn_eff = _pick_tn(dim) if tn is None else int(tn)
    assert (3 * dim) % tn_eff == 0, "tn must divide 3*dim"
    return tm_eff, tn_eff, M_pad


def _vmem_limit(tm: int, tn: int, dim: int, r: int, cbytes: int, obytes: int) -> int:
    """Per-step VMEM footprint (double-buffered) + headroom, capped at ~90% phys."""
    lane, sub = 128, 8
    r2 = _round_up(max(2 * r, 1), lane)
    need = (2 * tm * dim * cbytes                       # x tile
            + 2 * dim * tn * cbytes                     # W column tile
            + 2 * dim * r2 * cbytes                     # [Aq|Av] (lane-padded)
            + 2 * _round_up(max(2 * r, 1), sub) * tn * cbytes   # [[Bq 0 0],[0 0 Bv]]
            + 2 * sub * tn * 4                          # bias tile (f32, sublane-pad)
            + 2 * tm * tn * obytes                      # output tile
            + tm * r2 * 4)                              # u scratch (f32)
    need = int(need * 1.3) + (1 << 20)                  # compiler-scratch headroom
    try:
        phys = int(getattr(pltpu.get_tpu_info(), "vmem_capacity_bytes", 64 << 20))
    except Exception:                                   # pragma: no cover
        phys = 64 << 20                                 # conservative (v7x per-TC)
    return min(max(need, 32 << 20), phys * 9 // 10)


# ----------------------------------------------------------------------------
# kernels
# ----------------------------------------------------------------------------

def lora_qkv_kernel(x_ref, w_ref, b_ref, a_ref, bqv_ref, out_ref, u_ref):
    """One (tm, tn) tile of  x @ Wqkv + bias + (x @ [Aq|Av]) @ [[Bq 0 0],[0 0 Bv]]."""
    @pl.when(pl.program_id(1) == 0)
    def _():
        # LoRA down-projection: computed ONCE per token tile (j == 0) into a
        # VMEM scratch, reused for every output-column tile j (j is "arbitrary").
        u_ref[...] = jnp.dot(x_ref[...], a_ref[...],
                             preferred_element_type=jnp.float32)

    # Fused QKV projection tile (MXU), f32 accumulation.
    acc = jnp.dot(x_ref[...], w_ref[...], preferred_element_type=jnp.float32)
    # LoRA "up" matmul against the block-structured column tile: the zero rows
    # over the K block give a zero delta for free through the MXU.
    acc = acc + jnp.dot(u_ref[...].astype(bqv_ref.dtype), bqv_ref[...],
                        preferred_element_type=jnp.float32)
    out_ref[...] = (acc + b_ref[...]).astype(out_ref.dtype)   # bias already f32


def qkv_bias_kernel(x_ref, w_ref, b_ref, out_ref):
    """Merged-LoRA fast path: plain fused GEMM + bias tile."""
    acc = jnp.dot(x_ref[...], w_ref[...], preferred_element_type=jnp.float32)
    out_ref[...] = (acc + b_ref[...]).astype(out_ref.dtype)


# ----------------------------------------------------------------------------
# wrappers
# ----------------------------------------------------------------------------

@functools.partial(jax.jit,
                   static_argnames=("tm", "tn", "compute_dtype", "vmem_limit_bytes"))
def lora_forward(x, w_qkv, b_qkv, w_aq, w_bq, w_av, w_bv, *,
                 tm=512, tn=None, compute_dtype=None, vmem_limit_bytes=None):
    """x: [B, N, dim] -> [B, N, 3*dim]  (fused QKV with LoRA deltas on Q and V)."""
    B, N, dim = x.shape
    out_dim = 3 * dim
    r = w_aq.shape[1]
    M = B * N
    cdtype = jnp.dtype(compute_dtype) if compute_dtype is not None else x.dtype
    tm_eff, tn_eff, M_pad = _tiles(M, dim, tm, tn, cdtype)

    # --- operand packing (once per call, outside the kernel) -----------------
    x2 = x.reshape(M, dim).astype(cdtype)
    if M_pad != M:
        x2 = jnp.pad(x2, ((0, M_pad - M), (0, 0)))          # tail tokens -> zeros
    w2 = w_qkv.astype(cdtype)
    b2 = b_qkv.reshape(1, out_dim).astype(jnp.float32)       # pre-cast once

    # [Aq | Av]  and  [[Bq 0 0], [0 0 Bv]]
    a_qv = jnp.concatenate([w_aq, w_av], axis=1).astype(cdtype)            # (dim, 2r)
    z = jnp.zeros((r, dim), dtype=cdtype)
    b_qv = jnp.concatenate(
        [jnp.concatenate([w_bq.astype(cdtype), z, z], axis=1),
         jnp.concatenate([z, z, w_bv.astype(cdtype)], axis=1)], axis=0)    # (2r, 3dim)

    if vmem_limit_bytes is None:
        vmem_limit_bytes = _vmem_limit(tm_eff, tn_eff, dim, r,
                                       jnp.dtype(cdtype).itemsize,
                                       jnp.dtype(x.dtype).itemsize)

    grid = (M_pad // tm_eff, out_dim // tn_eff)
    out2 = pl.pallas_call(
        lora_qkv_kernel,
        out_shape=jax.ShapeDtypeStruct((M_pad, out_dim), x.dtype),
        grid_spec=pltpu.PrefetchScalarGridSpec(
            num_scalar_prefetch=0,
            grid=grid,
            in_specs=[
                pl.BlockSpec((tm_eff, dim), lambda i, j: (i, 0)),    # x (resident over j)
                pl.BlockSpec((dim, tn_eff), lambda i, j: (0, j)),    # W column tile
                pl.BlockSpec((1, tn_eff), lambda i, j: (0, j)),      # bias tile (f32)
                pl.BlockSpec((dim, 2 * r), lambda i, j: (0, 0)),     # [Aq|Av] (tiny)
                pl.BlockSpec((2 * r, tn_eff), lambda i, j: (0, j)),  # block-diag B
            ],
            out_specs=pl.BlockSpec((tm_eff, tn_eff), lambda i, j: (i, j)),
            scratch_shapes=[pltpu.VMEM((tm_eff, 2 * r), jnp.float32)],  # hoisted u
        ),
        compiler_params=pltpu.CompilerParams(
            # j must be "arbitrary": u is written at j == 0 and reused across
            # the row, so a core must never start mid-row.  i stays parallel.
            dimension_semantics=("parallel", "arbitrary"),
            vmem_limit_bytes=vmem_limit_bytes,
        ),
    )(x2, w2, b2, a_qv, b_qv)

    return out2[:M].reshape(B, N, out_dim)


def merge_lora_weights(w_qkv, w_aq, w_bq, w_av, w_bv):
    """Fold frozen LoRA adapters into the fused QKV weight.

    Call ONCE outside the per-step forward (perf review: the fold must not run
    on every call), then use qkv_forward() as a plain GEMM + bias.
    """
    dim = w_aq.shape[0]
    out_dim = w_qkv.shape[1]
    w = w_qkv.astype(jnp.float32)
    w = w.at[:, :dim].add(
        jnp.dot(w_aq.astype(jnp.float32), w_bq.astype(jnp.float32)))
    w = w.at[:, out_dim - dim:].add(
        jnp.dot(w_av.astype(jnp.float32), w_bv.astype(jnp.float32)))
    return w.astype(w_qkv.dtype)


@functools.partial(jax.jit,
                   static_argnames=("tm", "tn", "compute_dtype", "vmem_limit_bytes"))
def qkv_forward(x, w_eff, b_qkv, *, tm=512, tn=None, compute_dtype=None,
                vmem_limit_bytes=None):
    """Merged-LoRA (or plain) fused QKV projection: x @ W' + b."""
    B, N, dim = x.shape
    out_dim = w_eff.shape[1]
    M = B * N
    cdtype = jnp.dtype(compute_dtype) if compute_dtype is not None else x.dtype
    tm_eff, tn_eff, M_pad = _tiles(M, dim, tm, tn, cdtype)

    x2 = x.reshape(M, dim).astype(cdtype)
    if M_pad != M:
        x2 = jnp.pad(x2, ((0, M_pad - M), (0, 0)))
    b2 = b_qkv.reshape(1, out_dim).astype(jnp.float32)

    if vmem_limit_bytes is None:
        vmem_limit_bytes = _vmem_limit(tm_eff, tn_eff, dim, 0,
                                       jnp.dtype(cdtype).itemsize,
                                       jnp.dtype(x.dtype).itemsize)

    grid = (M_pad // tm_eff, out_dim // tn_eff)
    out2 = pl.pallas_call(
        qkv_bias_kernel,
        out_shape=jax.ShapeDtypeStruct((M_pad, out_dim), x.dtype),
        grid_spec=pltpu.PrefetchScalarGridSpec(
            num_scalar_prefetch=0,
            grid=grid,
            in_specs=[
                pl.BlockSpec((tm_eff, dim), lambda i, j: (i, 0)),
                pl.BlockSpec((dim, tn_eff), lambda i, j: (0, j)),
                pl.BlockSpec((1, tn_eff), lambda i, j: (0, j)),
            ],
            out_specs=pl.BlockSpec((tm_eff, tn_eff), lambda i, j: (i, j)),
        ),
        compiler_params=pltpu.CompilerParams(
            dimension_semantics=("parallel", "parallel"),
            vmem_limit_bytes=vmem_limit_bytes,
        ),
    )(x2, w_eff.astype(cdtype), b2)

    return out2[:M].reshape(B, N, out_dim)


# ----------------------------------------------------------------------------
# reference + demo
# ----------------------------------------------------------------------------

def reference_forward(x, w_qkv, b_qkv, w_aq, w_bq, w_av, w_bv):
    """Pure-JAX reference mirroring the PyTorch forward (high precision)."""
    dim = x.shape[-1]
    qkv = jnp.einsum("bnd,de->bne", x, w_qkv, precision="highest") + b_qkv.reshape(-1)
    new_q = jnp.einsum("bnd,dr,re->bne", x, w_aq, w_bq, precision="highest")
    new_v = jnp.einsum("bnd,dr,re->bne", x, w_av, w_bv, precision="highest")
    qkv = qkv.at[:, :, :dim].add(new_q)
    qkv = qkv.at[:, :, -dim:].add(new_v)
    return qkv


if __name__ == "__main__":
    # Small, lane-friendly shapes: 2 images x 128 tokens, hidden 128, rank 4.
    B, N, dim, r = 2, 128, 128, 4
    key = jax.random.PRNGKey(0)
    keys = jax.random.split(key, 7)

    x = jax.random.normal(keys[0], (B, N, dim), dtype=jnp.float32)

    # Deterministic synthetic parameters (stored as (in, out)).
    w_qkv = jax.random.normal(keys[1], (dim, 3 * dim), dtype=jnp.float32) * 0.05
    b_qkv = jax.random.normal(keys[2], (1, 3 * dim), dtype=jnp.float32) * 0.01
    w_aq = jax.random.normal(keys[3], (dim, r), dtype=jnp.float32) * 0.05
    w_bq = jax.random.normal(keys[4], (r, dim), dtype=jnp.float32) * 0.05
    w_av = jax.random.normal(keys[5], (dim, r), dtype=jnp.float32) * 0.05
    w_bv = jax.random.normal(keys[6], (r, dim), dtype=jnp.float32) * 0.05

    ref = reference_forward(x, w_qkv, b_qkv, w_aq, w_bq, w_av, w_bv)

    # 1) LoRA evaluated in-kernel (adapters trainable), f32 operands.
    out = jax.block_until_ready(
        lora_forward(x, w_qkv, b_qkv, w_aq, w_bq, w_av, w_bv))
    assert out.shape == (B, N, 3 * dim)
    assert jnp.allclose(out, ref, atol=2e-3, rtol=2e-3), "LoRA kernel mismatch (f32)"

    # 2) bf16-MXU fast path (f32 accumulation) — the recommended production mode.
    out_bf = jax.block_until_ready(
        lora_forward(x, w_qkv, b_qkv, w_aq, w_bq, w_av, w_bv,
                     compute_dtype=jnp.bfloat16))
    assert jnp.allclose(out_bf, ref, atol=5e-2, rtol=5e-2), "LoRA kernel mismatch (bf16)"

    # 3) merged-weight inference path: fold done ONCE outside the forward.
    w_eff = jax.block_until_ready(merge_lora_weights(w_qkv, w_aq, w_bq, w_av, w_bv))
    out_m = jax.block_until_ready(qkv_forward(x, w_eff, b_qkv))
    assert jnp.allclose(out_m, ref, atol=2e-3, rtol=2e-3), "merged-LoRA mismatch"

    print("KERNEL_OK")
</pallas_src>

<mosaic_0001>
module attributes {stable_mosaic.version = 11 : i64} {
  func.func @lora_qkv_kernel(%arg0: i32, %arg1: i32, %arg2: memref<128x128xf32, #tpu.memory_space<vmem>>, %arg3: memref<128x384xf32, #tpu.memory_space<vmem>>, %arg4: memref<1x384xf32, #tpu.memory_space<vmem>>, %arg5: memref<128x8xf32, #tpu.memory_space<vmem>>, %arg6: memref<8x384xf32, #tpu.memory_space<vmem>>, %arg7: memref<128x384xf32, #tpu.memory_space<vmem>>, %arg8: memref<128x8xf32, #tpu.memory_space<vmem>>) attributes {dimension_semantics = [#tpu.dimension_semantics<parallel>, #tpu.dimension_semantics<arbitrary>], iteration_bounds = array<i64: 2, 1>, scalar_prefetch = 0 : i64, scratch_operands = 1 : i64, tpu.core_type = #tpu.core_type<tc>, window_params = [{transform_indices = @transform_0, window_bounds = array<i64: 128, 128>}, {transform_indices = @transform_1, window_bounds = array<i64: 128, 384>}, {transform_indices = @transform_2, window_bounds = array<i64: 1, 384>}, {pipeline_mode = #tpu.pipeline_mode<synchronous>, transform_indices = @transform_3, window_bounds = array<i64: 128, 8>}, {transform_indices = @transform_4, window_bounds = array<i64: 8, 384>}, {transform_indices = @transform_5, window_bounds = array<i64: 128, 384>}]} {
    %c0_i32 = arith.constant 0 : i32
    %0 = arith.cmpi eq, %arg1, %c0_i32 : i32
    %1 = arith.extui %0 : i1 to i32
    %c0_i32_0 = arith.constant 0 : i32
    %2 = arith.cmpi ne, %1, %c0_i32_0 : i32
    scf.if %2 {
      %c0_13 = arith.constant 0 : index
      %c0_14 = arith.constant 0 : index
      %14 = vector.load %arg2[%c0_13, %c0_14] : memref<128x128xf32, #tpu.memory_space<vmem>>, vector<128x128xf32>
      %c0_15 = arith.constant 0 : index
      %c0_16 = arith.constant 0 : index
      %15 = vector.load %arg5[%c0_15, %c0_16] : memref<128x8xf32, #tpu.memory_space<vmem>>, vector<128x8xf32>
      %cst_17 = arith.constant dense<0.000000e+00> : vector<128x8xf32>
      %16 = tpu.matmul %14, %15, %cst_17 {dimension_numbers = #tpu.dot_dimension_numbers<[1], [0], [0], [1], [0, 0, 1, 1], [], []>} : vector<128x128xf32>, vector<128x8xf32>, vector<128x8xf32> -> vector<128x8xf32>
      %c0_18 = arith.constant 0 : index
      %c0_19 = arith.constant 0 : index
      %17 = vector.load %arg8[%c0_18, %c0_19] : memref<128x8xf32, #tpu.memory_space<vmem>>, vector<128x8xf32>
      tpu.vector_store %arg8[%c0_18, %c0_19], %16 {strides = array<i32>} : memref<128x8xf32, #tpu.memory_space<vmem>>, vector<128x8xf32>,
    } else {
    }
    %c0 = arith.constant 0 : index
    %c0_1 = arith.constant 0 : index
    %3 = vector.load %arg2[%c0, %c0_1] : memref<128x128xf32, #tpu.memory_space<vmem>>, vector<128x128xf32>
    %c0_2 = arith.constant 0 : index
    %c0_3 = arith.constant 0 : index
    %4 = vector.load %arg3[%c0_2, %c0_3] : memref<128x384xf32, #tpu.memory_space<vmem>>, vector<128x384xf32>
    %cst = arith.constant dense<0.000000e+00> : vector<128x384xf32>
    %5 = tpu.matmul %3, %4, %cst {dimension_numbers = #tpu.dot_dimension_numbers<[1], [0], [0], [1], [0, 0, 1, 1], [], []>} : vector<128x128xf32>, vector<128x384xf32>, vector<128x384xf32> -> vector<128x384xf32>
    %c0_4 = arith.constant 0 : index
    %c0_5 = arith.constant 0 : index
    %6 = vector.load %arg8[%c0_4, %c0_5] : memref<128x8xf32, #tpu.memory_space<vmem>>, vector<128x8xf32>
    %c0_6 = arith.constant 0 : index
    %c0_7 = arith.constant 0 : index
    %7 = vector.load %arg6[%c0_6, %c0_7] : memref<8x384xf32, #tpu.memory_space<vmem>>, vector<8x384xf32>
    %cst_8 = arith.constant dense<0.000000e+00> : vector<128x384xf32>
    %8 = tpu.matmul %6, %7, %cst_8 {dimension_numbers = #tpu.dot_dimension_numbers<[1], [0], [0], [1], [0, 0, 1, 1], [], []>} : vector<128x8xf32>, vector<8x384xf32>, vector<128x384xf32> -> vector<128x384xf32>
    %9 = arith.addf %5, %8 : vector<128x384xf32>
    %c0_9 = arith.constant 0 : index
    %c0_10 = arith.constant 0 : index
    %10 = vector.load %arg4[%c0_9, %c0_10] : memref<1x384xf32, #tpu.memory_space<vmem>>, vector<1x384xf32>
    %11 = vector.broadcast %10 : vector<1x384xf32> to vector<128x384xf32>
    %12 = arith.addf %9, %11 : vector<128x384xf32>
    %c0_11 = arith.constant 0 : index
    %c0_12 = arith.constant 0 : index
    %13 = vector.load %arg7[%c0_11, %c0_12] : memref<128x384xf32, #tpu.memory_space<vmem>>, vector<128x384xf32>
    tpu.vector_store %arg7[%c0_11, %c0_12], %12 {strides = array<i32>} : memref<128x384xf32, #tpu.memory_space<vmem>>, vector<128x384xf32>,
    return
  }
  func.func @transform_0(%arg0: i32, %arg1: i32) -> (i32, i32) {
    %c0_i32 = arith.constant 0 : i32
    %c0_i32_0 = arith.constant 0 : i32
    return %arg0, %c0_i32 : i32, i32
  }
  func.func @transform_1(%arg0: i32, %arg1: i32) -> (i32, i32) {
    %c0_i32 = arith.constant 0 : i32
    %c0_i32_0 = arith.constant 0 : i32
    return %c0_i32, %arg1 : i32, i32
  }
  func.func @transform_2(%arg0: i32, %arg1: i32) -> (i32, i32) {
    %c0_i32 = arith.constant 0 : i32
    %c0_i32_0 = arith.constant 0 : i32
    return %c0_i32, %arg1 : i32, i32
  }
  func.func @transform_3(%arg0: i32, %arg1: i32) -> (i32, i32) {
    %c0_i32 = arith.constant 0 : i32
    %c0_i32_0 = arith.constant 0 : i32
    %c0_i32_1 = arith.constant 0 : i32
    return %c0_i32, %c0_i32_0 : i32, i32
  }
  func.func @transform_4(%arg0: i32, %arg1: i32) -> (i32, i32) {
    %c0_i32 = arith.constant 0 : i32
    %c0_i32_0 = arith.constant 0 : i32
    return %c0_i32, %arg1 : i32, i32
  }
  func.func @transform_5(%arg0: i32, %arg1: i32) -> (i32, i32) {
    %c0_i32 = arith.constant 0 : i32
    return %arg0, %arg1 : i32, i32
  }
}

</mosaic_0001>

<bundles_post_ra>
// kernel: lora_forward.1
= control target key start
LH: loop header
LB: loop body
LE: loop exit
PB: predicated region body
PF: predicated region fallthrough
CT: control target
= control target key end

     0   :  { %s2176_s0 = inlined_call_operand.hbm [shape: f32[256,128], index: 0, kind: input, shape index: {}]   ;;  %s2177_s1 = inlined_call_operand.hbm [shape: f32[128,384], index: 1, kind: input, shape index: {}]   ;;  %s2178_s2 = inlined_call_operand.vmem [shape: f32[1,384], index: 2, kind: input, shape index: {}]   ;;  %s2179_s3 = inlined_call_operand.vmem [shape: f32[128,8], index: 3, kind: input, shape index: {}]   ;;  %s2180_s4 = inlined_call_operand.vmem [shape: f32[8,384], index: 4, kind: input, shape index: {}]   ;;  %s2181_s5 = inlined_call_operand.hbm [shape: f32[256,384], index: 5, kind: output, shape index: {}]  }
   0x1   :  { %2185 = sst [smem:[#allocation14_spill]] %s2177_s1 }
   0x2   :  { %10 = vsyncpa [#allocation4], 0 }
   0x3   :  { %12 = vsyncpa [#allocation4 + $0x1], 0 }
   0x4   :  { %13 = vsyncpa [#allocation7], 0 }
   0x5   :  { %14 = vsyncpa [#allocation5], 0 }
   0x6   :  { %16 = vsyncpa [#allocation5 + $0x1], 0  ;;  %s1551_s18 = smov 0   ;;  %s1553_s19 = smov 0  }
   0x7   :  { %s1555_s20 = smov 0   ;;  %s1557_s21 = smov 0  }
   0x8   :  { %s1559_s22 = smov 0   ;;  %s1561_s23 = smov 0  }
   0x9 LB: > { %2186 = sst [smem:[#allocation12_spill]] %s1512_s23  ;;  %s1215_s24 = sadd.s32 4294967295, %s1512_s23   ;;  %s1512_s23 = sphi %s1561_s23, %s22_s23   ;;  %s1508_s22 = sphi %s1559_s22, %s2202_s22   ;;  %s1504_s21 = sphi %s1557_s21, %s2201_s21   ;;  %s1500_s20 = sphi %s1555_s20, %s2200_s20   ;;  %s1496_s19 = sphi %s1553_s19, %s2199_s19   ;;  %s1492_s18 = sphi %s1551_s18, %s2198_s18  }
   0xa   : > { %s1216_s25 = sadd.s32 4294967294, %s1512_s23   ;;  %p54_p0 = scmp.ne.s32.totalorder %s1496_s19, %s1492_s18 }
   0xb   : > { %p1585_p1 = scmp.eq.s32.totalorder %s1215_s24, 0  ;;  %p1589_p2 = scmp.eq.s32.totalorder %s1215_s24, 1 }
   0xc   : > { %p185_p3 = scmp.eq.s32.totalorder %s1216_s25, 1  ;;  %p1217_p5 = scmp.ge.s32.totalorder %s1512_s23, 1 }
   0xd   : > { %p1595_p4 = por %p1585_p1, %p54_p0  ;;  %p192_p7 = scmp.lt.s32.totalorder %s1512_s23, 3 }
   0xe   : > { %p1600_p6 = por %p185_p3, %p54_p0  ;;  %s2191_s1 = sld [smem:[#allocation14_spill]] }
   0xf   : > { %p1608_p8 = pnand %p1217_p5, %p192_p7  ;;  %s1514_s9 = smov [#allocation6]  }
  0x10   : > { %s208_s10 = sshll.u32 %s1514_s9, 4  ;;  %p1221_p11 = scmp.ge.s32.totalorder %s1512_s23, 2  ;;  %s209_s10 = int_to_ptr.vmem [resolvable:$true] %s208_s10 }
  0x11   : > { %p1295_p9 = pneg %p1608_p8  ;;  %s1515_s11 = smov 384  }
  0x12   : > { %s1516_s12 = smov 24   ;;  %s34_s13 = sadd.s32 1, %s1508_s22 }
  0x13   : > { %p1296_p10 = pnand %p1295_p9, %p1585_p1  ;;  %p36_p12 = scmp.ge.s32.totalorder %s34_s13, 2 }
  0x14   : > { %s206_s7 = sshll.u32 %s2191_s1, 4  ;;  %s41_s14 = sadd.s32 1, %s1500_s20  ;;  %s207_s7 = int_to_ptr.hbm [resolvable:$true] %s206_s7 }
  0x15   : > { %1298 = dma.hbm_to_vmem [thread:$0]  (!%p1296_p10), %s207_s7, 6144, %s209_s10, [#allocation7], %s1515_s11, %s1515_s11, %s1516_s12  }
  0x16   : > { %p48_p13 = scmp.ne.s32.totalorder %s1500_s20, %s1496_s19  ;;  %p49_p0 = scmp.eq.s32.totalorder %s1512_s23, 0 }
  0x17   : > { %s2204_s13 = smov (%p36_p12, %s34_s13), 0  ;;  %p1308_p7 = scmp.lt.s32.totalorder %s1512_s23, 2 }
  0x18   : > { %2193 = sst [smem:[#allocation13_spill]] %s2204_s13  ;;  %p1624_p3 = por %p49_p0, %p48_p13 }
  0x19   : > { %p1630_p5 = por %p1589_p2, %p48_p13  ;;  %s38_s17 = ssub.s32 %s1508_s22, %s2204_s13 }
  0x1a   : > { %p39_p9 = scmp.eq.s32.totalorder %s38_s17, 0  ;;  %s242_s24 = sand.u32 1, %s1500_s20  }
  0x1b   : > { %s1222_s25 = sshll.u32 %s242_s24, 7  ;;  %s1281_s6 = sshll.u32 %s1508_s22, 7 }
  0x1c   : > { %s1639_s30 = scalar_select %p39_p9, %s1500_s20, %s41_s14  }
  0x1d   : > { %s251_s10 = scalar_lea.hbm %s2176_s0, %s1281_s6  ;;  %s246_s11 = scalar_lea.vmem [#allocation3], %s1222_s25 }
  0x1e   : > { %s254_s12 = sshll.u32 %s246_s11, 4  ;;  %s252_s27 = sshll.u32 %s251_s10, 4  ;;  %s255_s12 = int_to_ptr.vmem [resolvable:$true] %s254_s12  ;;  %s253_s27 = int_to_ptr.hbm [resolvable:$true] %s252_s27 }
  0x1f   : > { %p1300_p2 = pnand %p1308_p7, %p1624_p3  ;;  %s243_s1 = scalar_lea.sflag [#allocation4], %s242_s24 }
  0x20   : > { %s1517_s13 = smov 128   ;;  %s1518_s23 = smov 8  }
  0x21   : > { %1302 = dma.hbm_to_vmem [thread:$0]  (!%p1300_p2), %s253_s27, 2048, %s255_s12, %s243_s1, %s1517_s13, %s1517_s13, %s1518_s23  }
  0x22   : > { %266 = sbr.rel (%p1608_p8) target bundleno = 598 (0x256), region = 40  ;;  %s1650_s14 = sand.u32 (!%p1608_p8), 1, %s1496_s19  }
  0x23   : > { %s1226_s17 = sshll.u32 (!%p1608_p8), %s1650_s14, 7  ;;  %s269_s25 = scalar_lea.sflag (!%p1608_p8), [#allocation4], %s1650_s14 }
  0x24   : > { %s1654_s6 = scalar_lea.vmem (!%p1608_p8), [#allocation3], %s1226_s17 }
  0x27   : > { %1479 = dma.done.wait (%p1595_p4), %s269_s25, 2048  }
  0x28   : > { %1481 = vsyncadd (%p1595_p4), %s269_s25, 4294965248 }
  0x29   : > { %1483 = dma.done.wait (%p1585_p1), [#allocation7], 6144  }
  0x2a   : > { %1485 = vsyncadd (%p1585_p1), [#allocation7], 4294961152  ;;  %v364_v0 = vld [vmem:[%s2179_s3 + $0x78] sm:$0xff]  ;;  %v363_v1 = vld [vmem:[%s2179_s3 + $0x70] sm:$0xff]  ;;  %vm430_vm0 = vcmask 64512   ;;  %s1285_s7 = smul.u32 384, %s1650_s14 }
  0x2b   : > { %365 = vmatpush.msra.mxu0 %v364_v0  ;;  %v362_v2 = vld [vmem:[%s2179_s3 + $0x68] sm:$0xff]  ;;  %v361_v3 = vld [vmem:[%s2179_s3 + $0x60] sm:$0xff]  ;;  %v360_v4 = vld [vmem:[%s2179_s3 + $0x58] sm:$0xff]  ;;  %s1286_s9 = smul.u32 384, %s1504_s21  ;;  %s1074_s17 = scalar_lea.sflag [#allocation5], %s1650_s14 }
  0x2c   : > { %v359_v5 = vld [vmem:[%s2179_s3 + $0x50] sm:$0xff]  ;;  %v358_v6 = vld [vmem:[%s2179_s3 + $0x48] sm:$0xff]  ;;  %v357_v7 = vld [vmem:[%s2179_s3 + $0x40] sm:$0xff]  ;;  %s1997_s26 = scalar_lea.vmem [#allocation8], %s1285_s7  ;;  %s1446_s13 = scalar_lea.hbm %s2181_s5, 768 }
  0x2d   : > { %366 = vmatpush.msra.mxu0 %v363_v1  ;;  %v356_v8 = vld [vmem:[%s2179_s3 + $0x38] sm:$0xff]  ;;  %v355_v9 = vld [vmem:[%s2179_s3 + $0x30] sm:$0xff]  ;;  %v354_v10 = vld [vmem:[%s2179_s3 + $0x28] sm:$0xff]  ;;  %s1088_s12 = scalar_lea.hbm %s2181_s5, %s1286_s9  ;;  %s1089_s21 = sshll.u32 %s1997_s26, 4  ;;  %s1090_s21 = int_to_ptr.vmem [resolvable:$true] %s1089_s21 }
  0x2e   : > { %v353_v11 = vld [vmem:[%s2179_s3 + $0x20] sm:$0xff]  ;;  %v352_v12 = vld [vmem:[%s2179_s3 + $0x18] sm:$0xff]  ;;  %v351_v13 = vld [vmem:[%s2179_s3 + $0x10] sm:$0xff]  ;;  %s1091_s27 = sshll.u32 %s1088_s12, 4  ;;  %s1092_s27 = int_to_ptr.hbm [resolvable:$true] %s1091_s27 }
  0x2f   : > { %367 = vmatpush.msra.mxu0 %v362_v2  ;;  %v350_v14 = vld [vmem:[%s2179_s3 + $0x8] sm:$0xff]  ;;  %v349_v15 = vld [vmem:[%s2179_s3] sm:$0xff]  ;;  %v1721_v18 = vld [vmem:[%s1654_s6 + $0x10] sm:$0xff]  ;;  %s1440_s25 = sshra.s32 %s1092_s27, 4  ;;  %s1441_s25 = int_to_ptr.hbm [resolvable:$true] %s1440_s25 }
  0x30   : > { %v1713_v16 = vld [vmem:[%s1654_s6] sm:$0xff]  ;;  %v1717_v17 = vld [vmem:[%s1654_s6 + $0x8] sm:$0xff]  ;;  %v1725_v19 = vld [vmem:[%s1654_s6 + $0x18] sm:$0xff]  ;;  %s1442_s1 = scalar_lea.hbm %s1441_s25, 384  ;;  %p1447_p10 = scmp.lt.s32.totalorder %s1441_s25, %s2181_s5 }
  0x31   : > { %368 = vmatpush.msra.mxu0 %v361_v3  ;;  %v1729_v20 = vld [vmem:[%s1654_s6 + $0x20] sm:$0xff]  ;;  %v1733_v21 = vld [vmem:[%s1654_s6 + $0x28] sm:$0xff]  ;;  %v1737_v22 = vld [vmem:[%s1654_s6 + $0x30] sm:$0xff]  ;;  %p1443_p1 = scmp.ne.s32.totalorder %s1441_s25, %s1442_s1  ;;  %p1448_p12 = scmp.lt.s32.totalorder %s1446_s13, %s1442_s1 }
  0x32   : > { %v1741_v23 = vld [vmem:[%s1654_s6 + $0x38] sm:$0xff]  ;;  %v1745_v24 = vld [vmem:[%s1654_s6 + $0x40] sm:$0xff]  ;;  %v1749_v25 = vld [vmem:[%s1654_s6 + $0x48] sm:$0xff] }
  0x33   : > { %369 = vmatpush.msra.mxu0 %v360_v4  ;;  %v1753_v26 = vld [vmem:[%s1654_s6 + $0x50] sm:$0xff]  ;;  %v1757_v27 = vld [vmem:[%s1654_s6 + $0x58] sm:$0xff]  ;;  %v1761_v28 = vld [vmem:[%s1654_s6 + $0x60] sm:$0xff]  ;;  %p1444_p4 = pnand %p1443_p1, %p1630_p5  ;;  %p1449_p13 = por %p1448_p12, %p1447_p10 }
  0x34   : > { %v527_v29 = vld [vmem:[%s2180_s4] sm:$0xff]  ;;  %v1768_v30 = vld [vmem:[%s1654_s6 + $0x68] sm:$0xff]  ;;  %v1772_v31 = vld [vmem:[%s1654_s6 + $0x70] sm:$0xff] }
  0x35   : > { %370 = vmatpush.msra.mxu0 %v359_v5  ;;  %1282 = vmatpush.msra.mxu1 %v527_v29  ;;  %v1776_v32 = vld [vmem:[%s1654_s6 + $0x78] sm:$0xff]  ;;  %v528_v33 = vld [vmem:[%s2180_s4 + $0x8] sm:$0xff]  ;;  %v529_v34 = vld [vmem:[%s2180_s4 + $0x10] sm:$0xff]  ;;  %p1445_p8 = pneg %p1444_p4 }
  0x36   : > { %1283 = vmatpush.msra.mxu2 %v528_v33  ;;  %1284 = vmatpush.msra.mxu3 %v529_v34  ;;  %v509_v36 = vld [vmem:[#allocation6 + $0x170] sm:$0xff]  ;;  %v510_v37 = vld [vmem:[#allocation6 + $0x178] sm:$0xff]  ;;  %v508_v38 = vld [vmem:[#allocation6 + $0x168] sm:$0xff] }
  0x37   : > { %371 = vmatpush.msra.mxu0 %v358_v6  ;;  %774 = vmatpush.msrb.mxu1 %v508_v38  ;;  %v506_v41 = vld [vmem:[#allocation6 + $0x158] sm:$0xff]  ;;  %v507_v42 = vld [vmem:[#allocation6 + $0x160] sm:$0xff]  ;;  %v505_v43 = vld [vmem:[#allocation6 + $0x150] sm:$0xff]  ;;  %p1450_p0 = pnand %p1449_p13, %p1445_p8 }
  0x38   : > { %839 = vmatpush.msrb.mxu2 %v509_v36  ;;  %904 = vmatpush.msrb.mxu3 %v510_v37  ;;  %v503_v44 = vld [vmem:[#allocation6 + $0x140] sm:$0xff]  ;;  %v504_v45 = vld [vmem:[#allocation6 + $0x148] sm:$0xff]  ;;  %v502_v48 = vld [vmem:[#allocation6 + $0x138] sm:$0xff] }
  0x39   : > { %372 = vmatpush.msra.mxu0 %v357_v7  ;;  %775 = vmatpush.msrb.mxu1 %v505_v43  ;;  %v500_v49 = vld [vmem:[#allocation6 + $0x128] sm:$0xff]  ;;  %v501_v50 = vld [vmem:[#allocation6 + $0x130] sm:$0xff]  ;;  %v499_v53 = vld [vmem:[#allocation6 + $0x120] sm:$0xff] }
  0x3a   : > { %840 = vmatpush.msrb.mxu2 %v506_v41  ;;  %905 = vmatpush.msrb.mxu3 %v507_v42  ;;  %v497_v54 = vld [vmem:[#allocation6 + $0x110] sm:$0xff]  ;;  %v498_v55 = vld [vmem:[#allocation6 + $0x118] sm:$0xff]  ;;  %v496_v58 = vld [vmem:[#allocation6 + $0x108] sm:$0xff] }
  0x3b   : > { %373 = vmatpush.msra.mxu0 %v356_v8  ;;  %776 = vmatpush.msrb.mxu1 %v502_v48  ;;  %v494_v59 = vld [vmem:[#allocation6 + $0xf8] sm:$0xff]  ;;  %v495_v60 = vld [vmem:[#allocation6 + $0x100] sm:$0xff]  ;;  %v493_v63 = vld [vmem:[#allocation6 + $0xf0] sm:$0xff] }
  0x3c   : > { %841 = vmatpush.msrb.mxu2 %v503_v44  ;;  %906 = vmatpush.msrb.mxu3 %v504_v45  ;;  %v491_v0 = vld [vmem:[#allocation6 + $0xe0] sm:$0xff]  ;;  %v492_v1 = vld [vmem:[#allocation6 + $0xe8] sm:$0xff]  ;;  %v490_v2 = vld [vmem:[#allocation6 + $0xd8] sm:$0xff] }
  0x3d   : > { %374 = vmatpush.msra.mxu0 %v355_v9  ;;  %777 = vmatpush.msrb.mxu1 %v499_v53  ;;  %v488_v3 = vld [vmem:[#allocation6 + $0xc8] sm:$0xff]  ;;  %v489_v4 = vld [vmem:[#allocation6 + $0xd0] sm:$0xff]  ;;  %v487_v7 = vld [vmem:[#allocation6 + $0xc0] sm:$0xff] }
  0x3e   : > { %842 = vmatpush.msrb.mxu2 %v500_v49  ;;  %907 = vmatpush.msrb.mxu3 %v501_v50  ;;  %v485_v8 = vld [vmem:[#allocation6 + $0xb0] sm:$0xff]  ;;  %v486_v9 = vld [vmem:[#allocation6 + $0xb8] sm:$0xff]  ;;  %v475_v41 = vld [vmem:[#allocation6 + $0x60] sm:$0xff] }
  0x3f   : > { %375 = vmatpush.msra.mxu0 %v354_v10  ;;  %778 = vmatpush.msrb.mxu1 %v496_v58  ;;  %v478_v38 = vld [vmem:[#allocation6 + $0x78] sm:$0xff]  ;;  %v473_v42 = vld [vmem:[#allocation6 + $0x50] sm:$0xff]  ;;  %v471_v48 = vld [vmem:[#allocation6 + $0x40] sm:$0xff] }
  0x40   : > { %843 = vmatpush.msrb.mxu2 %v497_v54  ;;  %908 = vmatpush.msrb.mxu3 %v498_v55  ;;  %v474_v43 = vld [vmem:[#allocation6 + $0x58] sm:$0xff]  ;;  %v468_v53 = vld [vmem:[#allocation6 + $0x28] sm:$0xff]  ;;  %v465_v58 = vld [vmem:[#allocation6 + $0x10] sm:$0xff] }
  0x41   : > { %376 = vmatpush.msra.mxu0 %v353_v11  ;;  %779 = vmatpush.msrb.mxu1 %v493_v63 }
  0x42   : > { %844 = vmatpush.msrb.mxu2 %v494_v59  ;;  %909 = vmatpush.msrb.mxu3 %v495_v60  ;;  %v463_v59 = vld [vmem:[#allocation6] sm:$0xff] }
  0x43   : > { %377 = vmatpush.msra.mxu0 %v352_v12  ;;  %780 = vmatpush.msrb.mxu1 %v490_v2  ;;  %v484_v12 = vld [vmem:[#allocation6 + $0xa8] sm:$0xff] }
  0x44   : > { %845 = vmatpush.msrb.mxu2 %v491_v0  ;;  %910 = vmatpush.msrb.mxu3 %v492_v1 }
  0x45   : > { %378 = vmatpush.msra.mxu0 %v351_v13  ;;  %781 = vmatpush.msrb.mxu1 %v487_v7  ;;  %v482_v13 = vld [vmem:[#allocation6 + $0x98] sm:$0xff] }
  0x46   : > { %846 = vmatpush.msrb.mxu2 %v488_v3  ;;  %911 = vmatpush.msrb.mxu3 %v489_v4 }
  0x47   : > { %379 = vmatpush.msra.mxu0 %v350_v14  ;;  %v483_v14 = vld [vmem:[#allocation6 + $0xa0] sm:$0xff]  ;;  %782 = vmatpush.msrb.mxu1 %v484_v12 }
  0x48   : > { %847 = vmatpush.msrb.mxu2 %v485_v8  ;;  %912 = vmatpush.msrb.mxu3 %v486_v9 }
  0x49   : > { %380 = vmatpush.msra.mxu0 %v349_v15 }
  0x4a   : > { %381 = vmatmul.f32.vlgmr.msra.gmra.mxu0 %v1713_v16  ;;  %848 = vmatpush.msrb.mxu2 %v482_v13 }
  0x4b   : > { %594 = vmatpush.msrb.mxu0 %v527_v29  ;;  %913 = vmatpush.msrb.mxu3 %v483_v14 }
  0x4d   : > { %659 = vmatpush.msra.mxu0 %v528_v33  ;;  %v481_v33 = vld [vmem:[#allocation6 + $0x90] sm:$0xff] }
  0x4e   : > { %783 = vmatpush.msrb.mxu1 %v481_v33 }
  0x50   : > { %784 = vmatpush.msrb.mxu1 %v478_v38 }
  0x52   : > { %384 = vmatmul.f32.gmra.mxu0 %v1717_v17  ;;  %785 = vmatpush.msrb.mxu1 %v475_v41 }
  0x5a   : > { %387 = vmatmul.f32.gmra.mxu0 %v1721_v18 }
  0x62   : > { %390 = vmatmul.f32.gmra.mxu0 %v1725_v19 }
  0x6a   : > { %393 = vmatmul.f32.gmra.mxu0 %v1729_v20 }
  0x72   : > { %396 = vmatmul.f32.gmra.mxu0 %v1733_v21 }
  0x7a   : > { %399 = vmatmul.f32.gmra.mxu0 %v1737_v22 }
  0x82   : > { %402 = vmatmul.f32.gmra.mxu0 %v1741_v23 }
  0x8a   : > { %405 = vmatmul.f32.gmra.mxu0 %v1745_v24 }
  0x92   : > { %408 = vmatmul.f32.gmra.mxu0 %v1749_v25 }
  0x9a   : > { %411 = vmatmul.f32.gmra.mxu0 %v1753_v26 }
  0xa2   : > { %414 = vmatmul.f32.gmra.mxu0 %v1757_v27 }
  0xaa   : > { %417 = vmatmul.f32.gmra.mxu0 %v1761_v28 }
  0xb2   : > { %420 = vmatmul.f32.gmra.mxu0 %v1768_v30 }
  0xba   : > { %423 = vmatmul.f32.gmra.mxu0 %v1772_v31 }
  0xc2   : > { %426 = vmatmul.f32.gmra.mxu0 %v1776_v32 }
  0xc7   : > { %v382_v35 = vpop.f32.mrf.mxu0 }
  0xc8   : > { %431 = vst.msk [vmem:[#allocation2] sm:$0xff] %vm430_vm0, %v382_v35  ;;  %v480_v35 = vld [vmem:[#allocation6 + $0x88] sm:$0xff] }
  0xc9   : > { %914 = vmatpush.msrb.mxu3 %v480_v35 }
  0xcf   : > { %v385_v39 = vpop.f32.mrf.mxu0  ;;  %v1786_v40 = vld [vmem:[#allocation2] sm:$0xff] }
  0xd0   : > { %432 = vst.msk [vmem:[#allocation2 + $0x8] sm:$0xff] %vm430_vm0, %v385_v39  ;;  %1228 = vmatmul.msk.f32.vlgmr.msrb.gmra.mxu0 %vm430_vm0, %v1786_v40  ;;  %v476_v39 = vld [vmem:[#allocation6 + $0x68] sm:$0xff] }
  0xd1   : > { %724 = vmatpush.msrb.mxu0 %v529_v34  ;;  %v479_v34 = vld [vmem:[#allocation6 + $0x80] sm:$0xff] }
  0xd2   : > { %849 = vmatpush.msrb.mxu2 %v479_v34 }
  0xd4   : > { %850 = vmatpush.msrb.mxu2 %v476_v39 }
  0xd6   : > { %851 = vmatpush.msrb.mxu2 %v473_v42 }
  0xd7   : > { %v388_v46 = vpop.f32.mrf.mxu0  ;;  %v1791_v47 = vld [vmem:[#allocation2 + $0x8] sm:$0xff] }
  0xd8   : > { %433 = vst.msk [vmem:[#allocation2 + $0x10] sm:$0xff] %vm430_vm0, %v388_v46  ;;  %1229 = vmatmul.msk.f32.gmra.mxu0 %vm430_vm0, %v1791_v47  ;;  %v472_v46 = vld [vmem:[#allocation6 + $0x48] sm:$0xff] }
  0xd9   : > { %786 = vmatpush.msrb.mxu1 %v472_v46 }
  0xdf   : > { %v391_v51 = vpop.f32.mrf.mxu0  ;;  %v1796_v52 = vld [vmem:[#allocation2 + $0x10] sm:$0xff] }
  0xe0   : > { %434 = vst.msk [vmem:[#allocation2 + $0x18] sm:$0xff] %vm430_vm0, %v391_v51  ;;  %1230 = vmatmul.msk.f32.gmra.mxu0 %vm430_vm0, %v1796_v52  ;;  %v469_v51 = vld [vmem:[#allocation6 + $0x30] sm:$0xff] }
  0xe1   : > { %787 = vmatpush.msrb.mxu1 %v469_v51 }
  0xe7   : > { %v394_v56 = vpop.f32.mrf.mxu0  ;;  %v514_v57 = vld [vmem:[#allocation2 + $0x18] sm:$0xff] }
  0xe8   : > { %435 = vst.msk [vmem:[#allocation2 + $0x20] sm:$0xff] %vm430_vm0, %v394_v56  ;;  %1231 = vmatmul.msk.f32.vlgmr.msra.gmra.mxu1 %vm430_vm0, %v514_v57  ;;  %1244 = vmatmul.msk.f32.vlgmr.msra.gmra.mxu0 %vm430_vm0, %v1786_v40  ;;  %v466_v56 = vld [vmem:[#allocation6 + $0x18] sm:$0xff] }
  0xe9   : > { %1247 = vmatmul.msk.f32.vlgmr.msra.gmra.mxu2 %vm430_vm0, %v514_v57  ;;  %1263 = vmatmul.msk.f32.vlgmr.msra.gmra.mxu3 %vm430_vm0, %v514_v57  ;;  %v464_v57 = vld [vmem:[#allocation6 + $0x8] sm:$0xff] }
  0xea   : > { %788 = vmatpush.msrb.mxu1 %v466_v56 }
  0xec   : > { %789 = vmatpush.msrb.mxu1 %v463_v59 }
  0xef   : > { %v397_v61 = vpop.f32.mrf.mxu0  ;;  %v515_v62 = vld [vmem:[#allocation2 + $0x20] sm:$0xff] }
  0xf0   : > { %436 = vst.msk [vmem:[#allocation2 + $0x28] sm:$0xff] %vm430_vm0, %v397_v61  ;;  %1232 = vmatmul.msk.f32.gmra.mxu1 %vm430_vm0, %v515_v62  ;;  %1245 = vmatmul.msk.f32.gmra.mxu0 %vm430_vm0, %v1791_v47 }
  0xf1   : > { %1248 = vmatmul.msk.f32.gmra.mxu2 %vm430_vm0, %v515_v62  ;;  %1264 = vmatmul.msk.f32.gmra.mxu3 %vm430_vm0, %v515_v62 }
  0xf7   : > { %v400_v5 = vpop.f32.mrf.mxu0  ;;  %v516_v6 = vld [vmem:[#allocation2 + $0x28] sm:$0xff] }
  0xf8   : > { %437 = vst.msk [vmem:[#allocation2 + $0x30] sm:$0xff] %vm430_vm0, %v400_v5  ;;  %1233 = vmatmul.msk.f32.gmra.mxu1 %vm430_vm0, %v516_v6  ;;  %1246 = vmatmul.msk.f32.gmra.mxu0 %vm430_vm0, %v1796_v52 }
  0xf9   : > { %1249 = vmatmul.msk.f32.gmra.mxu2 %vm430_vm0, %v516_v6  ;;  %1265 = vmatmul.msk.f32.gmra.mxu3 %vm430_vm0, %v516_v6 }
  0xff   : > { %v403_v10 = vpop.f32.mrf.mxu0  ;;  %v517_v11 = vld [vmem:[#allocation2 + $0x30] sm:$0xff] }
 0x100   : > { %438 = vst.msk [vmem:[#allocation2 + $0x38] sm:$0xff] %vm430_vm0, %v403_v10  ;;  %1234 = vmatmul.msk.f32.gmra.mxu1 %vm430_vm0, %v517_v11  ;;  %1260 = vmatmul.msk.f32.vlgmr.msrb.gmra.mxu0 %vm430_vm0, %v1786_v40  ;;  %v477_v40 = vld [vmem:[#allocation6 + $0x70] sm:$0xff] }
 0x101   : > { %1250 = vmatmul.msk.f32.gmra.mxu2 %vm430_vm0, %v517_v11  ;;  %1266 = vmatmul.msk.f32.gmra.mxu3 %vm430_vm0, %v517_v11 }
 0x102   : > { %915 = vmatpush.msrb.mxu3 %v477_v40 }
 0x104   : > { %916 = vmatpush.msrb.mxu3 %v474_v43 }
 0x106   : > { %917 = vmatpush.msrb.mxu3 %v471_v48  ;;  %v969_v48 = vld [vmem:[%s2178_s2] sm:$0x7] }
 0x107   : > { %v406_v15 = vpop.f32.mrf.mxu0  ;;  %v518_v29 = vld [vmem:[#allocation2 + $0x38] sm:$0xff] }
 0x108   : > { %439 = vst.msk [vmem:[#allocation2 + $0x40] sm:$0xff] %vm430_vm0, %v406_v15  ;;  %1235 = vmatmul.msk.f32.gmra.mxu1 %vm430_vm0, %v518_v29  ;;  %1261 = vmatmul.msk.f32.gmra.mxu0 %vm430_vm0, %v1791_v47  ;;  %v470_v47 = vld [vmem:[#allocation6 + $0x38] sm:$0xff] }
 0x109   : > { %1251 = vmatmul.msk.f32.gmra.mxu2 %vm430_vm0, %v518_v29  ;;  %1267 = vmatmul.msk.f32.gmra.mxu3 %vm430_vm0, %v518_v29 }
 0x10a   : > { %852 = vmatpush.msrb.mxu2 %v470_v47  ;;  %918 = vmatpush.msrb.mxu3 %v468_v53 }
 0x10c   : > { %919 = vmatpush.msrb.mxu3 %v465_v58 }
 0x10f   : > { %v409_v36 = vpop.f32.mrf.mxu0  ;;  %v519_v37 = vld [vmem:[#allocation2 + $0x40] sm:$0xff] }
 0x110   : > { %440 = vst.msk [vmem:[#allocation2 + $0x48] sm:$0xff] %vm430_vm0, %v409_v36  ;;  %1236 = vmatmul.msk.f32.gmra.mxu1 %vm430_vm0, %v519_v37  ;;  %1262 = vmatmul.msk.f32.gmra.mxu0 %vm430_vm0, %v1796_v52  ;;  %v467_v52 = vld [vmem:[#allocation6 + $0x20] sm:$0xff] }
 0x111   : > { %1252 = vmatmul.msk.f32.gmra.mxu2 %vm430_vm0, %v519_v37  ;;  %1268 = vmatmul.msk.f32.gmra.mxu3 %vm430_vm0, %v519_v37 }
 0x112   : > { %853 = vmatpush.msrb.mxu2 %v467_v52 }
 0x114   : > { %854 = vmatpush.msrb.mxu2 %v464_v57 }
 0x117   : > { %v412_v44 = vpop.f32.mrf.mxu0  ;;  %v520_v45 = vld [vmem:[#allocation2 + $0x48] sm:$0xff] }
 0x118   : > { %441 = vst.msk [vmem:[#allocation2 + $0x50] sm:$0xff] %vm430_vm0, %v412_v44  ;;  %1237 = vmatmul.msk.f32.gmra.mxu1 %vm430_vm0, %v520_v45 }
 0x119   : > { %1253 = vmatmul.msk.f32.gmra.mxu2 %vm430_vm0, %v520_v45  ;;  %1269 = vmatmul.msk.f32.gmra.mxu3 %vm430_vm0, %v520_v45 }
 0x11f   : > { %v415_v49 = vpop.f32.mrf.mxu0  ;;  %v521_v50 = vld [vmem:[#allocation2 + $0x50] sm:$0xff] }
 0x120   : > { %442 = vst.msk [vmem:[#allocation2 + $0x58] sm:$0xff] %vm430_vm0, %v415_v49  ;;  %1238 = vmatmul.msk.f32.gmra.mxu1 %vm430_vm0, %v521_v50 }
 0x121   : > { %1254 = vmatmul.msk.f32.gmra.mxu2 %vm430_vm0, %v521_v50  ;;  %1270 = vmatmul.msk.f32.gmra.mxu3 %vm430_vm0, %v521_v50  ;;  %v1994_v50 = vperm.slane %v969_v48, 0 }
 0x127   : > { %v418_v54 = vpop.f32.mrf.mxu0  ;;  %v522_v55 = vld [vmem:[#allocation2 + $0x58] sm:$0xff] }
 0x128   : > { %443 = vst.msk [vmem:[#allocation2 + $0x60] sm:$0xff] %vm430_vm0, %v418_v54  ;;  %1239 = vmatmul.msk.f32.gmra.mxu1 %vm430_vm0, %v522_v55 }
 0x129   : > { %1255 = vmatmul.msk.f32.gmra.mxu2 %vm430_vm0, %v522_v55  ;;  %1271 = vmatmul.msk.f32.gmra.mxu3 %vm430_vm0, %v522_v55  ;;  %v2002_v55 = vperm.slane %v969_v48, 2 }
 0x12f   : > { %v421_v60 = vpop.f32.mrf.mxu0  ;;  %v523_v61 = vld [vmem:[#allocation2 + $0x60] sm:$0xff] }
 0x130   : > { %444 = vst.msk [vmem:[#allocation2 + $0x68] sm:$0xff] %vm430_vm0, %v421_v60  ;;  %1240 = vmatmul.msk.f32.gmra.mxu1 %vm430_vm0, %v523_v61 }
 0x131   : > { %1256 = vmatmul.msk.f32.gmra.mxu2 %vm430_vm0, %v523_v61  ;;  %1272 = vmatmul.msk.f32.gmra.mxu3 %vm430_vm0, %v523_v61 }
 0x137   : > { %v424_v62 = vpop.f32.mrf.mxu0  ;;  %v524_v63 = vld [vmem:[#allocation2 + $0x68] sm:$0xff] }
 0x138   : > { %445 = vst.msk [vmem:[#allocation2 + $0x70] sm:$0xff] %vm430_vm0, %v424_v62  ;;  %1241 = vmatmul.msk.f32.gmra.mxu1 %vm430_vm0, %v524_v63 }
 0x139   : > { %1257 = vmatmul.msk.f32.gmra.mxu2 %vm430_vm0, %v524_v63  ;;  %1273 = vmatmul.msk.f32.gmra.mxu3 %vm430_vm0, %v524_v63 }
 0x13f   : > { %v427_v0 = vpop.f32.mrf.mxu0  ;;  %v525_v1 = vld [vmem:[#allocation2 + $0x70] sm:$0xff] }
 0x140   : > { %446 = vst.msk [vmem:[#allocation2 + $0x78] sm:$0xff] %vm430_vm0, %v427_v0  ;;  %1242 = vmatmul.msk.f32.gmra.mxu1 %vm430_vm0, %v525_v1 }
 0x141   : > { %1258 = vmatmul.msk.f32.gmra.mxu2 %vm430_vm0, %v525_v1  ;;  %1274 = vmatmul.msk.f32.gmra.mxu3 %vm430_vm0, %v525_v1 }
 0x147   : > { %v526_v2 = vld [vmem:[#allocation2 + $0x78] sm:$0xff] }
 0x148   : > { %1243 = vmatmul.msk.f32.gmra.mxu1 %vm430_vm0, %v526_v2 }
 0x149   : > { %1259 = vmatmul.msk.f32.gmra.mxu2 %vm430_vm0, %v526_v2  ;;  %1275 = vmatmul.msk.f32.gmra.mxu3 %vm430_vm0, %v526_v2 }
 0x150   : > { %790 = vmatmul.f32.vlgmr.msrb.gmra.mxu1 %v1713_v16 }
 0x151   : > { %855 = vmatmul.f32.vlgmr.msrb.gmra.mxu2 %v1713_v16  ;;  %920 = vmatmul.f32.vlgmr.msrb.gmra.mxu3 %v1713_v16 }
 0x158   : > { %793 = vmatmul.f32.gmra.mxu1 %v1717_v17 }
 0x159   : > { %858 = vmatmul.f32.gmra.mxu2 %v1717_v17  ;;  %923 = vmatmul.f32.gmra.mxu3 %v1717_v17 }
 0x160   : > { %796 = vmatmul.f32.gmra.mxu1 %v1721_v18 }
 0x161   : > { %861 = vmatmul.f32.gmra.mxu2 %v1721_v18  ;;  %926 = vmatmul.f32.gmra.mxu3 %v1721_v18 }
 0x165   : > { %v1873_v3 = vpop.f32.mrf.mxu1 }
 0x168   : > { %799 = vmatmul.f32.gmra.mxu1 %v1725_v19 }
 0x169   : > { %864 = vmatmul.f32.gmra.mxu2 %v1725_v19  ;;  %929 = vmatmul.f32.gmra.mxu3 %v1725_v19 }
 0x16c   : > { %v1878_v16 = vpop.f32.mrf.mxu2  ;;  %v1880_v4 = vpop.f32.mrf.mxu3 }
 0x16d   : > { %v1882_v5 = vpop.f32.mrf.mxu1 }
 0x170   : > { %802 = vmatmul.f32.gmra.mxu1 %v1729_v20 }
 0x171   : > { %867 = vmatmul.f32.gmra.mxu2 %v1729_v20  ;;  %932 = vmatmul.f32.gmra.mxu3 %v1729_v20 }
 0x174   : > { %v1887_v17 = vpop.f32.mrf.mxu2  ;;  %v1889_v18 = vpop.f32.mrf.mxu3 }
 0x175   : > { %v1891_v6 = vpop.f32.mrf.mxu1 }
 0x178   : > { %805 = vmatmul.f32.gmra.mxu1 %v1733_v21 }
 0x179   : > { %870 = vmatmul.f32.gmra.mxu2 %v1733_v21  ;;  %935 = vmatmul.f32.gmra.mxu3 %v1733_v21 }
 0x17c   : > { %v1896_v19 = vpop.f32.mrf.mxu2  ;;  %v1898_v7 = vpop.f32.mrf.mxu3 }
 0x17d   : > { %v1900_v8 = vpop.f32.mrf.mxu1 }
 0x180   : > { %808 = vmatmul.f32.gmra.mxu1 %v1737_v22 }
 0x181   : > { %873 = vmatmul.f32.gmra.mxu2 %v1737_v22  ;;  %938 = vmatmul.f32.gmra.mxu3 %v1737_v22  ;;  %v596_v22 = vpop.f32.mrf.mxu0 }
 0x184   : > { %v1905_v20 = vpop.f32.mrf.mxu2  ;;  %v1907_v9 = vpop.f32.mrf.mxu3 }
 0x185   : > { %v1909_v10 = vpop.f32.mrf.mxu1 }
 0x188   : > { %811 = vmatmul.f32.gmra.mxu1 %v1741_v23 }
 0x189   : > { %876 = vmatmul.f32.gmra.mxu2 %v1741_v23  ;;  %941 = vmatmul.f32.gmra.mxu3 %v1741_v23  ;;  %v599_v33 = vpop.f32.mrf.mxu0 }
 0x18c   : > { %v1914_v21 = vpop.f32.mrf.mxu2  ;;  %v1916_v11 = vpop.f32.mrf.mxu3 }
 0x18d   : > { %v1918_v12 = vpop.f32.mrf.mxu1 }
 0x190   : > { %814 = vmatmul.f32.gmra.mxu1 %v1745_v24 }
 0x191   : > { %879 = vmatmul.f32.gmra.mxu2 %v1745_v24  ;;  %944 = vmatmul.f32.gmra.mxu3 %v1745_v24 }
 0x194   : > { %v1923_v13 = vpop.f32.mrf.mxu2  ;;  %v1925_v14 = vpop.f32.mrf.mxu3 }
 0x195   : > { %v1927_v15 = vpop.f32.mrf.mxu1 }
 0x198   : > { %817 = vmatmul.f32.gmra.mxu1 %v1749_v25 }
 0x199   : > { %882 = vmatmul.f32.gmra.mxu2 %v1749_v25  ;;  %947 = vmatmul.f32.gmra.mxu3 %v1749_v25  ;;  %v602_v25 = vpop.f32.mrf.mxu0 }
 0x19c   : > { %v1932_v23 = vpop.f32.mrf.mxu2  ;;  %v1934_v29 = vpop.f32.mrf.mxu3 }
 0x19d   : > { %v1936_v34 = vpop.f32.mrf.mxu1 }
 0x1a0   : > { %820 = vmatmul.f32.gmra.mxu1 %v1753_v26 }
 0x1a1   : > { %885 = vmatmul.f32.gmra.mxu2 %v1753_v26  ;;  %950 = vmatmul.f32.gmra.mxu3 %v1753_v26  ;;  %v661_v26 = vpop.f32.mrf.mxu0 }
 0x1a4   : > { %v1941_v24 = vpop.f32.mrf.mxu2  ;;  %v1943_v35 = vpop.f32.mrf.mxu3 }
 0x1a5   : > { %v1945_v36 = vpop.f32.mrf.mxu1 }
 0x1a8   : > { %823 = vmatmul.f32.gmra.mxu1 %v1757_v27 }
 0x1a9   : > { %888 = vmatmul.f32.gmra.mxu2 %v1757_v27  ;;  %953 = vmatmul.f32.gmra.mxu3 %v1757_v27  ;;  %v664_v27 = vpop.f32.mrf.mxu0 }
 0x1ac   : > { %v1950_v37 = vpop.f32.mrf.mxu2  ;;  %v1952_v38 = vpop.f32.mrf.mxu3 }
 0x1ad   : > { %v1954_v39 = vpop.f32.mrf.mxu1 }
 0x1b0   : > { %826 = vmatmul.f32.gmra.mxu1 %v1761_v28 }
 0x1b1   : > { %891 = vmatmul.f32.gmra.mxu2 %v1761_v28  ;;  %956 = vmatmul.f32.gmra.mxu3 %v1761_v28  ;;  %v667_v47 = vpop.f32.mrf.mxu0 }
 0x1b4   : > { %v1959_v40 = vpop.f32.mrf.mxu2  ;;  %v1961_v41 = vpop.f32.mrf.mxu3 }
 0x1b5   : > { %v1963_v42 = vpop.f32.mrf.mxu1 }
 0x1b8   : > { %829 = vmatmul.f32.gmra.mxu1 %v1768_v30 }
 0x1b9   : > { %894 = vmatmul.f32.gmra.mxu2 %v1768_v30  ;;  %959 = vmatmul.f32.gmra.mxu3 %v1768_v30  ;;  %v726_v53 = vpop.f32.mrf.mxu0 }
 0x1bc   : > { %v1968_v43 = vpop.f32.mrf.mxu2  ;;  %v1970_v44 = vpop.f32.mrf.mxu3 }
 0x1bd   : > { %v1972_v45 = vpop.f32.mrf.mxu1 }
 0x1c0   : > { %832 = vmatmul.f32.gmra.mxu1 %v1772_v31 }
 0x1c1   : > { %897 = vmatmul.f32.gmra.mxu2 %v1772_v31  ;;  %962 = vmatmul.f32.gmra.mxu3 %v1772_v31  ;;  %v729_v1 = vpop.f32.mrf.mxu0 }
 0x1c4   : > { %v1977_v28 = vpop.f32.mrf.mxu2  ;;  %v1979_v46 = vpop.f32.mrf.mxu3 }
 0x1c5   : > { %v1981_v30 = vpop.f32.mrf.mxu1 }
 0x1c8   : > { %835 = vmatmul.f32.gmra.mxu1 %v1776_v32 }
 0x1c9   : > { %900 = vmatmul.f32.gmra.mxu2 %v1776_v32  ;;  %965 = vmatmul.f32.gmra.mxu3 %v1776_v32  ;;  %v2000_v32 = vperm.slane %v969_v48, 1 }
 0x1cc   : > { %v1990_v49 = vpop.f32.mrf.mxu2  ;;  %v1992_v31 = vpop.f32.mrf.mxu3 }
 0x1cd   : > { %v791_v51 = vpop.f32.mrf.mxu1 }
 0x1ce   : > { %v792_v52 = vadd.f32 %v791_v51, %v596_v22 }
 0x1d0   : > { %v977_v54 = vadd.f32 %v1994_v50, %v792_v52 }
 0x1d2   : > { %1025 = vst [vmem:[%s1997_s26] sm:$0xff] %v977_v54 }
 0x1d4   : > { %v856_v56 = vpop.f32.mrf.mxu2  ;;  %v921_v57 = vpop.f32.mrf.mxu3 }
 0x1d5   : > { %v857_v58 = vadd.f32 %v856_v56, %v661_v26  ;;  %v922_v59 = vadd.f32 %v921_v57, %v726_v53  ;;  %v794_v60 = vpop.f32.mrf.mxu1  ;;  %v732_v56 = vpop.f32.mrf.mxu0 }
 0x1d6   : > { %v795_v61 = vadd.f32 %v794_v60, %v599_v33 }
 0x1d7   : > { %v978_v62 = vadd.f32 %v2000_v32, %v857_v58  ;;  %v979_v63 = vadd.f32 %v2002_v55, %v922_v59 }
 0x1d8   : > { %v980_v0 = vadd.f32 %v1994_v50, %v795_v61 }
 0x1d9   : > { %1026 = vst [vmem:[%s1997_s26 + $0x8] sm:$0xff] %v978_v62 }
 0x1da   : > { %1027 = vst [vmem:[%s1997_s26 + $0x10] sm:$0xff] %v979_v63 }
 0x1db   : > { %1028 = vst [vmem:[%s1997_s26 + $0x18] sm:$0xff] %v980_v0 }
 0x1dc   : > { %v859_v2 = vpop.f32.mrf.mxu2  ;;  %v924_v22 = vpop.f32.mrf.mxu3 }
 0x1dd   : > { %v860_v48 = vadd.f32 %v859_v2, %v664_v27  ;;  %v925_v26 = vadd.f32 %v924_v22, %v729_v1  ;;  %v797_v51 = vpop.f32.mrf.mxu1 }
 0x1de   : > { %v798_v52 = vadd.f32 %v797_v51, %v602_v25 }
 0x1df   : > { %v981_v33 = vadd.f32 %v2000_v32, %v860_v48  ;;  %v982_v53 = vadd.f32 %v2002_v55, %v925_v26 }
 0x1e0   : > { %v983_v54 = vadd.f32 %v1994_v50, %v798_v52 }
 0x1e1   : > { %1029 = vst [vmem:[%s1997_s26 + $0x20] sm:$0xff] %v981_v33 }
 0x1e2   : > { %1030 = vst [vmem:[%s1997_s26 + $0x28] sm:$0xff] %v982_v53 }
 0x1e3   : > { %1031 = vst [vmem:[%s1997_s26 + $0x30] sm:$0xff] %v983_v54 }
 0x1e4   : > { %v862_v57 = vpop.f32.mrf.mxu2  ;;  %v927_v58 = vpop.f32.mrf.mxu3 }
 0x1e5   : > { %v863_v59 = vadd.f32 %v862_v57, %v667_v47  ;;  %v928_v27 = vadd.f32 %v927_v58, %v732_v56  ;;  %v800_v60 = vpop.f32.mrf.mxu1 }
 0x1e6   : > { %v801_v25 = vadd.f32 %v800_v60, %v1873_v3 }
 0x1e7   : > { %v984_v61 = vadd.f32 %v2000_v32, %v863_v59  ;;  %v985_v62 = vadd.f32 %v2002_v55, %v928_v27 }
 0x1e8   : > { %v986_v63 = vadd.f32 %v1994_v50, %v801_v25 }
 0x1e9   : > { %1032 = vst [vmem:[%s1997_s26 + $0x38] sm:$0xff] %v984_v61 }
 0x1ea   : > { %1033 = vst [vmem:[%s1997_s26 + $0x40] sm:$0xff] %v985_v62 }
 0x1eb   : > { %1034 = vst [vmem:[%s1997_s26 + $0x48] sm:$0xff] %v986_v63 }
 0x1ec   : > { %v865_v0 = vpop.f32.mrf.mxu2  ;;  %v930_v1 = vpop.f32.mrf.mxu3 }
 0x1ed   : > { %v866_v47 = vadd.f32 %v865_v0, %v1878_v16  ;;  %v931_v2 = vadd.f32 %v930_v1, %v1880_v4  ;;  %v803_v22 = vpop.f32.mrf.mxu1 }
 0x1ee   : > { %v804_v3 = vadd.f32 %v803_v22, %v1882_v5 }
 0x1ef   : > { %v987_v48 = vadd.f32 %v2000_v32, %v866_v47  ;;  %v988_v26 = vadd.f32 %v2002_v55, %v931_v2 }
 0x1f0   : > { %v989_v51 = vadd.f32 %v1994_v50, %v804_v3 }
 0x1f1   : > { %1035 = vst [vmem:[%s1997_s26 + $0x50] sm:$0xff] %v987_v48 }
 0x1f2   : > { %1036 = vst [vmem:[%s1997_s26 + $0x58] sm:$0xff] %v988_v26 }
 0x1f3   : > { %1037 = vst [vmem:[%s1997_s26 + $0x60] sm:$0xff] %v989_v51 }
 0x1f4   : > { %v868_v52 = vpop.f32.mrf.mxu2  ;;  %v933_v33 = vpop.f32.mrf.mxu3 }
 0x1f5   : > { %v869_v16 = vadd.f32 %v868_v52, %v1887_v17  ;;  %v934_v4 = vadd.f32 %v933_v33, %v1889_v18  ;;  %v806_v53 = vpop.f32.mrf.mxu1 }
 0x1f6   : > { %v807_v5 = vadd.f32 %v806_v53, %v1891_v6 }
 0x1f7   : > { %v990_v54 = vadd.f32 %v2000_v32, %v869_v16  ;;  %v991_v56 = vadd.f32 %v2002_v55, %v934_v4 }
 0x1f8   : > { %v992_v57 = vadd.f32 %v1994_v50, %v807_v5 }
 0x1f9   : > { %1038 = vst [vmem:[%s1997_s26 + $0x68] sm:$0xff] %v990_v54 }
 0x1fa   : > { %1039 = vst [vmem:[%s1997_s26 + $0x70] sm:$0xff] %v991_v56 }
 0x1fb   : > { %1040 = vst [vmem:[%s1997_s26 + $0x78] sm:$0xff] %v992_v57 }
 0x1fc   : > { %v871_v58 = vpop.f32.mrf.mxu2  ;;  %v936_v59 = vpop.f32.mrf.mxu3 }
 0x1fd   : > { %v872_v17 = vadd.f32 %v871_v58, %v1896_v19  ;;  %v937_v18 = vadd.f32 %v936_v59, %v1898_v7  ;;  %v809_v27 = vpop.f32.mrf.mxu1 }
 0x1fe   : > { %v810_v6 = vadd.f32 %v809_v27, %v1900_v8 }
 0x1ff   : > { %v993_v60 = vadd.f32 %v2000_v32, %v872_v17  ;;  %v994_v25 = vadd.f32 %v2002_v55, %v937_v18 }
 0x200   : > { %v995_v61 = vadd.f32 %v1994_v50, %v810_v6 }
 0x201   : > { %1041 = vst [vmem:[%s1997_s26 + $0x80] sm:$0xff] %v993_v60 }
 0x202   : > { %1042 = vst [vmem:[%s1997_s26 + $0x88] sm:$0xff] %v994_v25 }
 0x203   : > { %1043 = vst [vmem:[%s1997_s26 + $0x90] sm:$0xff] %v995_v61 }
 0x204   : > { %v874_v62 = vpop.f32.mrf.mxu2  ;;  %v939_v63 = vpop.f32.mrf.mxu3 }
 0x205   : > { %v875_v19 = vadd.f32 %v874_v62, %v1905_v20  ;;  %v940_v7 = vadd.f32 %v939_v63, %v1907_v9  ;;  %v812_v0 = vpop.f32.mrf.mxu1 }
 0x206   : > { %v813_v8 = vadd.f32 %v812_v0, %v1909_v10 }
 0x207   : > { %v996_v1 = vadd.f32 %v2000_v32, %v875_v19  ;;  %v997_v47 = vadd.f32 %v2002_v55, %v940_v7 }
 0x208   : > { %v998_v2 = vadd.f32 %v1994_v50, %v813_v8 }
 0x209   : > { %1044 = vst [vmem:[%s1997_s26 + $0x98] sm:$0xff] %v996_v1 }
 0x20a   : > { %1045 = vst [vmem:[%s1997_s26 + $0xa0] sm:$0xff] %v997_v47 }
 0x20b   : > { %1046 = vst [vmem:[%s1997_s26 + $0xa8] sm:$0xff] %v998_v2 }
 0x20c   : > { %v877_v22 = vpop.f32.mrf.mxu2  ;;  %v942_v3 = vpop.f32.mrf.mxu3 }
 0x20d   : > { %v878_v20 = vadd.f32 %v877_v22, %v1914_v21  ;;  %v943_v9 = vadd.f32 %v942_v3, %v1916_v11  ;;  %v815_v48 = vpop.f32.mrf.mxu1 }
 0x20e   : > { %v816_v10 = vadd.f32 %v815_v48, %v1918_v12 }
 0x20f   : > { %v999_v26 = vadd.f32 %v2000_v32, %v878_v20  ;;  %v1000_v51 = vadd.f32 %v2002_v55, %v943_v9 }
 0x210   : > { %v1001_v52 = vadd.f32 %v1994_v50, %v816_v10 }
 0x211   : > { %1047 = vst [vmem:[%s1997_s26 + $0xb0] sm:$0xff] %v999_v26 }
 0x212   : > { %1048 = vst [vmem:[%s1997_s26 + $0xb8] sm:$0xff] %v1000_v51 }
 0x213   : > { %1049 = vst [vmem:[%s1997_s26 + $0xc0] sm:$0xff] %v1001_v52 }
 0x214   : > { %v880_v33 = vpop.f32.mrf.mxu2  ;;  %v945_v16 = vpop.f32.mrf.mxu3 }
 0x215   : > { %v881_v21 = vadd.f32 %v880_v33, %v1923_v13  ;;  %v946_v11 = vadd.f32 %v945_v16, %v1925_v14  ;;  %v818_v4 = vpop.f32.mrf.mxu1 }
 0x216   : > { %v819_v12 = vadd.f32 %v818_v4, %v1927_v15 }
 0x217   : > { %v1002_v53 = vadd.f32 %v2000_v32, %v881_v21  ;;  %v1003_v5 = vadd.f32 %v2002_v55, %v946_v11 }
 0x218   : > { %v1004_v54 = vadd.f32 %v1994_v50, %v819_v12 }
 0x219   : > { %1050 = vst [vmem:[%s1997_s26 + $0xc8] sm:$0xff] %v1002_v53 }
 0x21a   : > { %1051 = vst [vmem:[%s1997_s26 + $0xd0] sm:$0xff] %v1003_v5 }
 0x21b   : > { %1052 = vst [vmem:[%s1997_s26 + $0xd8] sm:$0xff] %v1004_v54 }
 0x21c   : > { %v883_v56 = vpop.f32.mrf.mxu2  ;;  %v948_v57 = vpop.f32.mrf.mxu3 }
 0x21d   : > { %v884_v13 = vadd.f32 %v883_v56, %v1932_v23  ;;  %v949_v14 = vadd.f32 %v948_v57, %v1934_v29  ;;  %v821_v58 = vpop.f32.mrf.mxu1 }
 0x21e   : > { %v822_v15 = vadd.f32 %v821_v58, %v1936_v34 }
 0x21f   : > { %v1005_v59 = vadd.f32 %v2000_v32, %v884_v13  ;;  %v1006_v17 = vadd.f32 %v2002_v55, %v949_v14 }
 0x220   : > { %v1007_v18 = vadd.f32 %v1994_v50, %v822_v15 }
 0x221   : > { %1053 = vst [vmem:[%s1997_s26 + $0xe0] sm:$0xff] %v1005_v59 }
 0x222   : > { %1054 = vst [vmem:[%s1997_s26 + $0xe8] sm:$0xff] %v1006_v17 }
 0x223   : > { %1055 = vst [vmem:[%s1997_s26 + $0xf0] sm:$0xff] %v1007_v18 }
 0x224   : > { %v886_v27 = vpop.f32.mrf.mxu2  ;;  %v951_v6 = vpop.f32.mrf.mxu3 }
 0x225   : > { %v887_v23 = vadd.f32 %v886_v27, %v1941_v24  ;;  %v952_v29 = vadd.f32 %v951_v6, %v1943_v35  ;;  %v824_v60 = vpop.f32.mrf.mxu1 }
 0x226   : > { %v825_v34 = vadd.f32 %v824_v60, %v1945_v36 }
 0x227   : > { %v1008_v25 = vadd.f32 %v2000_v32, %v887_v23  ;;  %v1009_v61 = vadd.f32 %v2002_v55, %v952_v29 }
 0x228   : > { %v1010_v62 = vadd.f32 %v1994_v50, %v825_v34 }
 0x229   : > { %1056 = vst [vmem:[%s1997_s26 + $0xf8] sm:$0xff] %v1008_v25 }
 0x22a   : > { %1057 = vst [vmem:[%s1997_s26 + $0x100] sm:$0xff] %v1009_v61 }
 0x22b   : > { %1058 = vst [vmem:[%s1997_s26 + $0x108] sm:$0xff] %v1010_v62 }
 0x22c   : > { %v889_v63 = vpop.f32.mrf.mxu2  ;;  %v954_v19 = vpop.f32.mrf.mxu3 }
 0x22d   : > { %v890_v24 = vadd.f32 %v889_v63, %v1950_v37  ;;  %v955_v35 = vadd.f32 %v954_v19, %v1952_v38  ;;  %v827_v7 = vpop.f32.mrf.mxu1 }
 0x22e   : > { %v828_v36 = vadd.f32 %v827_v7, %v1954_v39 }
 0x22f   : > { %v1011_v0 = vadd.f32 %v2000_v32, %v890_v24  ;;  %v1012_v8 = vadd.f32 %v2002_v55, %v955_v35 }
 0x230   : > { %v1013_v1 = vadd.f32 %v1994_v50, %v828_v36 }
 0x231   : > { %1059 = vst [vmem:[%s1997_s26 + $0x110] sm:$0xff] %v1011_v0 }
 0x232   : > { %1060 = vst [vmem:[%s1997_s26 + $0x118] sm:$0xff] %v1012_v8 }
 0x233   : > { %1061 = vst [vmem:[%s1997_s26 + $0x120] sm:$0xff] %v1013_v1 }
 0x234   : > { %v892_v47 = vpop.f32.mrf.mxu2  ;;  %v957_v2 = vpop.f32.mrf.mxu3 }
 0x235   : > { %v893_v37 = vadd.f32 %v892_v47, %v1959_v40  ;;  %v958_v38 = vadd.f32 %v957_v2, %v1961_v41  ;;  %v830_v22 = vpop.f32.mrf.mxu1 }
 0x236   : > { %v831_v39 = vadd.f32 %v830_v22, %v1963_v42 }
 0x237   : > { %v1014_v3 = vadd.f32 %v2000_v32, %v893_v37  ;;  %v1015_v20 = vadd.f32 %v2002_v55, %v958_v38 }
 0x238   : > { %v1016_v9 = vadd.f32 %v1994_v50, %v831_v39 }
 0x239   : > { %1062 = vst [vmem:[%s1997_s26 + $0x128] sm:$0xff] %v1014_v3 }
 0x23a   : > { %1063 = vst [vmem:[%s1997_s26 + $0x130] sm:$0xff] %v1015_v20 }
 0x23b   : > { %1064 = vst [vmem:[%s1997_s26 + $0x138] sm:$0xff] %v1016_v9 }
 0x23c   : > { %v895_v48 = vpop.f32.mrf.mxu2  ;;  %v960_v10 = vpop.f32.mrf.mxu3 }
 0x23d   : > { %v896_v40 = vadd.f32 %v895_v48, %v1968_v43  ;;  %v961_v41 = vadd.f32 %v960_v10, %v1970_v44  ;;  %v833_v42 = vpop.f32.mrf.mxu1 }
 0x23e   : > { %v834_v26 = vadd.f32 %v833_v42, %v1972_v45 }
 0x23f   : > { %v1017_v51 = vadd.f32 %v2000_v32, %v896_v40  ;;  %v1018_v52 = vadd.f32 %v2002_v55, %v961_v41 }
 0x240   : > { %v1019_v33 = vadd.f32 %v1994_v50, %v834_v26 }
 0x241   : > { %1065 = vst [vmem:[%s1997_s26 + $0x140] sm:$0xff] %v1017_v51 }
 0x242   : > { %1066 = vst [vmem:[%s1997_s26 + $0x148] sm:$0xff] %v1018_v52 }
 0x243   : > { %1067 = vst [vmem:[%s1997_s26 + $0x150] sm:$0xff] %v1019_v33 }
 0x244   : > { %v898_v16 = vpop.f32.mrf.mxu2  ;;  %v963_v43 = vpop.f32.mrf.mxu3 }
 0x245   : > { %v899_v44 = vadd.f32 %v898_v16, %v1977_v28  ;;  %v964_v21 = vadd.f32 %v963_v43, %v1979_v46  ;;  %v836_v45 = vpop.f32.mrf.mxu1 }
 0x246   : > { %v837_v11 = vadd.f32 %v836_v45, %v1981_v30 }
 0x247   : > { %v1020_v4 = vadd.f32 %v2000_v32, %v899_v44  ;;  %v1021_v12 = vadd.f32 %v2002_v55, %v964_v21 }
 0x248   : > { %v1022_v53 = vadd.f32 %v1994_v50, %v837_v11 }
 0x249   : > { %1068 = vst [vmem:[%s1997_s26 + $0x158] sm:$0xff] %v1020_v4 }
 0x24a   : > { %1069 = vst [vmem:[%s1997_s26 + $0x160] sm:$0xff] %v1021_v12 }
 0x24b   : > { %1070 = vst [vmem:[%s1997_s26 + $0x168] sm:$0xff] %v1022_v53 }
 0x24c   : > { %v901_v28 = vpop.f32.mrf.mxu2  ;;  %v966_v46 = vpop.f32.mrf.mxu3 }
 0x24d   : > { %v902_v30 = vadd.f32 %v901_v28, %v1990_v49  ;;  %v967_v5 = vadd.f32 %v966_v46, %v1992_v31 }
 0x24f   : > { %v1023_v50 = vadd.f32 %v2000_v32, %v902_v30  ;;  %v1024_v54 = vadd.f32 %v2002_v55, %v967_v5 }
 0x251   : > { %1071 = vst [vmem:[%s1997_s26 + $0x170] sm:$0xff] %v1023_v50 }
 0x252   : > { %1072 = vst [vmem:[%s1997_s26 + $0x178] sm:$0xff] %v1024_v54 }
 0x253   : > { %1453 = shalt.err (!%p1450_p0)
}
 0x254   : > { %s1519_s14 = smov 384   ;;  %s1520_s6 = smov 24  }
 0x255   : > { %1293 = dma.vmem_to_hbm [thread:$0]  (%p1630_p5), %s1090_s21, 6144, %s1092_s27, %s1074_s17, %s1519_s14, %s1519_s14, %s1520_s6  }
 0x256 PF: > { %s2196_s28 = sld [smem:[#allocation12_spill]]  ;;  %s1106_s7 = sand.u32 1, %s1492_s18  }
 0x257   : > { %p1304_p3 = pnand %p1221_p11, %p1600_p6  ;;  %s1107_s26 = scalar_lea.sflag [#allocation5], %s1106_s7 }
 0x259   : > { %p1305_p7 = pneg %p1304_p3 }
 0x25b   : > { %1487 = dma.done.wait (%p1305_p7), %s1107_s26, 6144  }
 0x25c   : > { %1489 = vsyncadd (%p1305_p7), %s1107_s26, 4294961152  ;;  %s22_s23 = sadd.s32 1, %s2196_s28   ;;  %s2197_s16 = sld [smem:[#allocation13_spill]] }
 0x25d   : > { %p19_p9 = scmp.ge.s32.totalorder %s22_s23, 4   ;;  %s2198_s18 = smov %s1496_s19 }
 0x25e   : > { %s2199_s19 = smov %s1500_s20  ;;  %s2200_s20 = smov %s1639_s30 }
 0x25f   : > { %s2201_s21 = smov %s1508_s22  ;;  %21 = sbr.rel (!%p19_p9) target bundleno = 9 (0x9), region = 100 }
 0x262   : > { %s2202_s22 = smov %s2197_s16 }
 0x264   :  { %1113 = vsyncpa [#allocation4], 1 }
 0x265   :  { %1115 = vsyncpa [#allocation4 + $0x1], 1 }
 0x266   :  { %1116 = vsyncpa [#allocation7], 1 }
 0x267   :  { %1117 = vsyncpa [#allocation5], 1 }
 0x268   :  { %1119 = vsyncpa [#allocation5 + $0x1], 1 }

</bundles_post_ra>
